<compile_context>
chip_gen: v5e
topology: v5e:2x2
jax: 0.10.0
libtpu: 0.0.40
codegen_flags: <defaults>
</compile_context>

<pallas_src>
import jax
import jax.numpy as jnp
from jax.experimental import pallas as pl
from jax.experimental.pallas import tpu as pltpu

BATCH = 8             # batch_size (len(ng_list))
NUM_NEG = 8           # num_neg_sample
NUM_PTS = 100         # synthetic point-set size
NUM_PTS_PAD = 128     # point tables padded to 128 rows (lane-dense one-hot)
COORD_DIM = 2
FREQ_NUM = 32         # frequency_num of the grid-cell spatial encoder
FEAT_DIM = 32         # raw point feature dim consumed by `enc`
SPA_EMBED_DIM = 64    # g_spa_enc output dim
EMBED_DIM = 64        # final embedding dim

SIN_FEAT = COORD_DIM * FREQ_NUM       # 64 scaled-coord channels
SINARG_DIM = 2 * SIN_FEAT             # 128 lanes: [sin args | cos args]
TOTAL_IDS = BATCH + BATCH * NUM_NEG   # 72 rows (center + flattened neg ids)

# ---- parameter-slab layout (rows, 256 lanes, f32) ----
SLAB_LANES = 256
TBL_ROW0, TBL_ROW1 = 0, NUM_PTS_PAD           # (128,256): [sinarg|emb|b2]
W1_ROW0, W1_ROW1 = 128, 256                    # (128, 64) in lanes 0:64
W2_ROW0, W2_ROW1 = 256, 320                    # (64, 128) = [0 | W2]
B1_ROW = 320                                   # (1, 64)
SLAB_ROWS = 328                                # padded to a multiple of 8


# --------------------------------------------------------------------------
# Single fused Pallas kernel
# --------------------------------------------------------------------------
def _fused_kernel(ids_ref, slab_ref, out_ref):
    """ids_ref:  (72, 1) int32 -- [center_ids ; neg_ids.flatten()]
       slab_ref: (328, 256) f32 -- packed tables / weights / biases
       out_ref:  (72, 128) f32 -- rows 0:8   = [center_embed | center_pred]
                                  rows 8:72  = [neg_embed    | (ignored)]
    """
    ids = ids_ref[...]                                            # (72, 1)

    # One-hot "gather" matrix (VPU compare, MXU matmul path).
    lane = jax.lax.broadcasted_iota(jnp.int32, (TOTAL_IDS, NUM_PTS_PAD), 1)
    onehot = (ids == lane).astype(jnp.float32)                    # (72, 128)

    # Fused gather of everything per-point in ONE matmul:
    #   lanes   0:128 -> range-reduced sin/cos arguments
    #   lanes 128:192 -> precomputed enc() embedding (feat @ W_enc + b_enc)
    #   lanes 192:256 -> decoder bias b2 (picked up once per valid id)
    tbl = slab_ref[TBL_ROW0:TBL_ROW1, :]                          # (128, 256)
    gathered = jnp.dot(onehot, tbl,
                       preferred_element_type=jnp.float32)        # (72, 256)

    # ---- g_spa_dec(g_spa_enc(center coords)) on the first BATCH rows ----
    sfeat = jnp.sin(gathered[0:BATCH, 0:SINARG_DIM])              # (8, 128)
    w1 = slab_ref[W1_ROW0:W1_ROW1, 0:SPA_EMBED_DIM]               # (128, 64)
    b1 = slab_ref[B1_ROW:B1_ROW + 1, 0:SPA_EMBED_DIM]             # (1, 64)
    h = jnp.maximum(
        jnp.dot(sfeat, w1, preferred_element_type=jnp.float32) + b1, 0.0)

    # W2 is stored pre-shifted into lanes 64:128 -> pred lands lane-dense.
    w2_hi = slab_ref[W2_ROW0:W2_ROW1, 0:2 * EMBED_DIM]            # (64, 128)
    pred_hi = jnp.dot(h, w2_hi,
                      preferred_element_type=jnp.float32)         # (8, 128)

    # Lane-dense unmasked 128-lane stores, single output slab.
    # rows 0:8 : [center_embed | h@W2 + b2]   (b2 arrives via the gather)
    out_ref[0:BATCH, :] = gathered[0:BATCH, SINARG_DIM:] + pred_hi
    # rows 8:72: [neg_embed | b2-junk]  (junk lanes dropped in the wrapper)
    out_ref[BATCH:, :] = gathered[BATCH:, SINARG_DIM:]


def _vmem_spec():
    return pl.BlockSpec(memory_space=pltpu.MemorySpace.VMEM)


def _cost_estimate():
    flops = 2 * (TOTAL_IDS * NUM_PTS_PAD * SLAB_LANES     # fused gather
                 + BATCH * SINARG_DIM * SPA_EMBED_DIM     # sfeat @ W1
                 + BATCH * SPA_EMBED_DIM * 2 * EMBED_DIM) # h @ W2_hi
    transcendentals = BATCH * SINARG_DIM                  # jnp.sin
    bytes_accessed = 4 * (TOTAL_IDS * 1
                          + SLAB_ROWS * SLAB_LANES
                          + TOTAL_IDS * 2 * EMBED_DIM)
    return pl.CostEstimate(flops=flops, transcendentals=transcendentals,
                           bytes_accessed=bytes_accessed)


# --------------------------------------------------------------------------
# Forward pass (matches PyTorch forward(), do_full_eval=True)
# --------------------------------------------------------------------------
def forward(params, center_ids, neg_ids):
    """Returns (center_pred_embed, center_embed, neg_embeds)."""
    b, k = neg_ids.shape
    ids_all = jnp.concatenate(
        [center_ids.astype(jnp.int32),
         neg_ids.reshape(-1).astype(jnp.int32)], axis=0).reshape(-1, 1)

    out = pl.pallas_call(
        _fused_kernel,
        out_shape=jax.ShapeDtypeStruct((TOTAL_IDS, 2 * EMBED_DIM), jnp.float32),
        in_specs=[_vmem_spec(), _vmem_spec()],
        out_specs=_vmem_spec(),
        cost_estimate=_cost_estimate(),
    )(ids_all, params["slab"])

    center_embed = out[:BATCH, :EMBED_DIM]                 # (B, E)
    center_pred_embed = out[:BATCH, EMBED_DIM:]            # (B, E)
    neg_embeds = out[BATCH:, :EMBED_DIM].reshape(b, k, EMBED_DIM)

    # TODO(synk): NeighborGraph construction / sample_neg_pts resampling is
    # host-side Python bookkeeping with no Pallas equivalent; neg ids arrive
    # as a precomputed (B, K) index array instead.
    return center_pred_embed, center_embed, neg_embeds


# --------------------------------------------------------------------------
# Parameters (synthetic, deterministic) + packed kernel-resident slab
# --------------------------------------------------------------------------
def make_freq_scales(freq_num, lambda_min=1.0, lambda_max=100.0):
    f = jnp.arange(freq_num, dtype=jnp.float32)
    lam = lambda_min * (lambda_max / lambda_min) ** (f / max(freq_num - 1, 1))
    return 1.0 / lam                                          # (F,)


def init_params(key):
    ks = jax.random.split(key, 9)
    scale = 0.1
    pt_coords = jax.random.uniform(ks[0], (NUM_PTS, COORD_DIM),
                                   jnp.float32, 0.0, 100.0)
    pt_feats = jax.random.normal(ks[1], (NUM_PTS, FEAT_DIM), jnp.float32)
    w1_sin = scale * jax.random.normal(ks[2], (SIN_FEAT, SPA_EMBED_DIM),
                                       jnp.float32)
    w1_cos = scale * jax.random.normal(ks[3], (SIN_FEAT, SPA_EMBED_DIM),
                                       jnp.float32)
    w2 = scale * jax.random.normal(ks[4], (SPA_EMBED_DIM, EMBED_DIM),
                                   jnp.float32)
    w_enc = scale * jax.random.normal(ks[5], (FEAT_DIM, EMBED_DIM),
                                      jnp.float32)
    b1 = scale * jax.random.normal(ks[6], (1, SPA_EMBED_DIM), jnp.float32)
    b2 = scale * jax.random.normal(ks[7], (1, EMBED_DIM), jnp.float32)
    b_enc = scale * jax.random.normal(ks[8], (1, EMBED_DIM), jnp.float32)
    freq_scales = make_freq_scales(FREQ_NUM)

    # ---- derived, kernel-resident packed slab (parameter preprocessing) ----
    # per-point scaled coords, [x*s_0..x*s_{F-1}, y*s_0..y*s_{F-1}]
    scaled = (pt_coords[:, :, None] * freq_scales[None, None, :]
              ).reshape(NUM_PTS, SIN_FEAT)
    half_pi = jnp.float32(jnp.pi / 2.0)
    two_pi = jnp.float32(2.0 * jnp.pi)
    args = jnp.concatenate([scaled, scaled + half_pi], axis=1)   # (100, 128)
    # range-reduce to ~[-pi, pi) so reduced-precision MXU gathers stay exact
    args = args - two_pi * jnp.round(args / two_pi)
    sinarg_tbl = jnp.pad(args, ((0, NUM_PTS_PAD - NUM_PTS), (0, 0)))  # (128,128)

    # enc() folded into the table: emb_tbl = feats @ W_enc + b_enc
    emb_tbl = pt_feats @ w_enc + b_enc                               # (100, 64)
    emb_tbl = jnp.pad(emb_tbl, ((0, NUM_PTS_PAD - NUM_PTS), (0, 0)))  # (128, 64)

    # decoder bias b2, picked up once per valid id via the one-hot gather
    b2_blk = jnp.pad(jnp.broadcast_to(b2, (NUM_PTS, EMBED_DIM)),
                     ((0, NUM_PTS_PAD - NUM_PTS), (0, 0)))           # (128, 64)

    tbl = jnp.concatenate([sinarg_tbl, emb_tbl, b2_blk], axis=1)     # (128, 256)

    w1_cat = jnp.concatenate([w1_sin, w1_cos], axis=0)               # (128, 64)
    w1_blk = jnp.pad(w1_cat, ((0, 0), (0, SLAB_LANES - SPA_EMBED_DIM)))

    w2_hi = jnp.concatenate(
        [jnp.zeros((SPA_EMBED_DIM, EMBED_DIM), jnp.float32), w2], axis=1)  # (64,128)
    w2_blk = jnp.pad(w2_hi, ((0, 0), (0, SLAB_LANES - 2 * EMBED_DIM)))

    b1_blk = jnp.pad(b1, ((0, 0), (0, SLAB_LANES - SPA_EMBED_DIM)))  # (1, 256)

    slab = jnp.concatenate(
        [tbl, w1_blk, w2_blk, b1_blk,
         jnp.zeros((SLAB_ROWS - (B1_ROW + 1), SLAB_LANES), jnp.float32)],
        axis=0)                                                       # (328, 256)
    assert slab.shape == (SLAB_ROWS, SLAB_LANES)

    return {
        # raw module parameters (used by the pure-JAX reference)
        "pt_coords": pt_coords, "pt_feats": pt_feats,
        "w1_sin": w1_sin, "w1_cos": w1_cos, "b1": b1,
        "w2": w2, "b2": b2, "w_enc": w_enc, "b_enc": b_enc,
        "freq_scales": freq_scales,
        # kernel-resident packed parameter slab
        "slab": slab,
    }


# --------------------------------------------------------------------------
# Pure-JAX reference (mirrors the original 3-stage forward)
# --------------------------------------------------------------------------
def reference_forward(params, center_ids, neg_ids):
    coords = params["pt_coords"][center_ids]                       # (B, 2)
    scales = params["freq_scales"]
    scaled = (coords[:, :, None] * scales[None, None, :]
              ).reshape(coords.shape[0], SIN_FEAT)
    h = jnp.maximum(jnp.sin(scaled) @ params["w1_sin"]
                    + jnp.cos(scaled) @ params["w1_cos"]
                    + params["b1"], 0.0)
    center_pred = h @ params["w2"] + params["b2"]
    center_embed = params["pt_feats"][center_ids] @ params["w_enc"] \
        + params["b_enc"]
    b, k = neg_ids.shape
    neg = (params["pt_feats"][neg_ids.reshape(-1)] @ params["w_enc"]
           + params["b_enc"]).reshape(b, k, EMBED_DIM)
    return center_pred, center_embed, neg


if __name__ == "__main__":
    root = jax.random.PRNGKey(0)
    kp, kc, kn = jax.random.split(root, 3)
    params = init_params(kp)
    center_ids = jax.random.randint(kc, (BATCH,), 0, NUM_PTS)
    neg_ids = jax.random.randint(kn, (BATCH, NUM_NEG), 0, NUM_PTS)

    fwd = jax.jit(forward)
    center_pred_embed, center_embed, neg_embeds = fwd(params, center_ids,
                                                      neg_ids)
    jax.block_until_ready((center_pred_embed, center_embed, neg_embeds))

    assert center_pred_embed.shape == (BATCH, EMBED_DIM)
    assert center_embed.shape == (BATCH, EMBED_DIM)
    assert neg_embeds.shape == (BATCH, NUM_NEG, EMBED_DIM)

    r_pred, r_center, r_neg = jax.jit(reference_forward)(params, center_ids,
                                                         neg_ids)
    ok = (jnp.allclose(center_pred_embed, r_pred, rtol=2e-2, atol=2e-2)
          & jnp.allclose(center_embed, r_center, rtol=2e-2, atol=2e-2)
          & jnp.allclose(neg_embeds, r_neg, rtol=2e-2, atol=2e-2))
    assert bool(ok), "Pallas kernel output mismatch vs JAX reference"
    print("KERNEL_OK")
</pallas_src>

<mosaic_0001>
module attributes {stable_mosaic.version = 11 : i64} {
  func.func @_fused_kernel(%arg0: memref<72x1xi32, #tpu.memory_space<vmem>>, %arg1: memref<328x256xf32, #tpu.memory_space<vmem>>, %arg2: memref<72x128xf32, #tpu.memory_space<vmem>>) attributes {dimension_semantics = [], scalar_prefetch = 0 : i64, scratch_operands = 0 : i64, tpu.core_type = #tpu.core_type<tc>} {
    %c0 = arith.constant 0 : index
    %c0_0 = arith.constant 0 : index
    %0 = vector.load %arg0[%c0, %c0_0] : memref<72x1xi32, #tpu.memory_space<vmem>>, vector<72x1xi32>
    %1 = tpu.iota {dimensions = array<i32: 1>} : vector<72x128xi32>
    %2 = vector.broadcast %0 : vector<72x1xi32> to vector<72x128xi32>
    %3 = arith.cmpi eq, %2, %1 : vector<72x128xi32>
    %4 = arith.extui %3 : vector<72x128xi1> to vector<72x128xi32>
    %5 = arith.sitofp %4 : vector<72x128xi32> to vector<72x128xf32>
    %c0_1 = arith.constant 0 : index
    %c0_2 = arith.constant 0 : index
    %6 = vector.load %arg1[%c0_1, %c0_2] : memref<328x256xf32, #tpu.memory_space<vmem>>, vector<128x256xf32>
    %cst = arith.constant dense<0.000000e+00> : vector<72x256xf32>
    %7 = tpu.matmul %5, %6, %cst {dimension_numbers = #tpu.dot_dimension_numbers<[1], [0], [0], [1], [0, 0, 1, 1], [], []>} : vector<72x128xf32>, vector<128x256xf32>, vector<72x256xf32> -> vector<72x256xf32>
    %8 = vector.extract_strided_slice %7 {offsets = [0, 0], sizes = [8, 128], strides = [1, 1]} : vector<72x256xf32> to vector<8x128xf32>
    %9 = math.sin %8 : vector<8x128xf32>
    %c128 = arith.constant 128 : index
    %c0_3 = arith.constant 0 : index
    %10 = vector.load %arg1[%c128, %c0_3] : memref<328x256xf32, #tpu.memory_space<vmem>>, vector<128x64xf32>
    %c320 = arith.constant 320 : index
    %c0_4 = arith.constant 0 : index
    %11 = vector.load %arg1[%c320, %c0_4] : memref<328x256xf32, #tpu.memory_space<vmem>>, vector<1x64xf32>
    %cst_5 = arith.constant dense<0.000000e+00> : vector<8x64xf32>
    %12 = tpu.matmul %9, %10, %cst_5 {dimension_numbers = #tpu.dot_dimension_numbers<[1], [0], [0], [1], [0, 0, 1, 1], [], []>} : vector<8x128xf32>, vector<128x64xf32>, vector<8x64xf32> -> vector<8x64xf32>
    %13 = vector.broadcast %11 : vector<1x64xf32> to vector<8x64xf32>
    %14 = arith.addf %12, %13 : vector<8x64xf32>
    %cst_6 = arith.constant 0.000000e+00 : f32
    %15 = vector.broadcast %cst_6 : f32 to vector<8x64xf32>
    %16 = arith.maximumf %14, %15 : vector<8x64xf32>
    %c256 = arith.constant 256 : index
    %c0_7 = arith.constant 0 : index
    %17 = vector.load %arg1[%c256, %c0_7] : memref<328x256xf32, #tpu.memory_space<vmem>>, vector<64x128xf32>
    %cst_8 = arith.constant dense<0.000000e+00> : vector<8x128xf32>
    %18 = tpu.matmul %16, %17, %cst_8 {dimension_numbers = #tpu.dot_dimension_numbers<[1], [0], [0], [1], [0, 0, 1, 1], [], []>} : vector<8x64xf32>, vector<64x128xf32>, vector<8x128xf32> -> vector<8x128xf32>
    %19 = vector.extract_strided_slice %7 {offsets = [0, 128], sizes = [8, 128], strides = [1, 1]} : vector<72x256xf32> to vector<8x128xf32>
    %20 = arith.addf %19, %18 : vector<8x128xf32>
    %c0_9 = arith.constant 0 : index
    %c0_10 = arith.constant 0 : index
    %21 = vector.load %arg2[%c0_9, %c0_10] : memref<72x128xf32, #tpu.memory_space<vmem>>, vector<8x128xf32>
    tpu.vector_store %arg2[%c0_9, %c0_10], %20 {strides = array<i32>} : memref<72x128xf32, #tpu.memory_space<vmem>>, vector<8x128xf32>,
    %22 = vector.extract_strided_slice %7 {offsets = [8, 128], sizes = [64, 128], strides = [1, 1]} : vector<72x256xf32> to vector<64x128xf32>
    %c8 = arith.constant 8 : index
    %c0_11 = arith.constant 0 : index
    %23 = vector.load %arg2[%c8, %c0_11] : memref<72x128xf32, #tpu.memory_space<vmem>>, vector<64x128xf32>
    tpu.vector_store %arg2[%c8, %c0_11], %22 {strides = array<i32>} : memref<72x128xf32, #tpu.memory_space<vmem>>, vector<64x128xf32>,
    return
  }
}

</mosaic_0001>

<bundles_post_ra>
// kernel: forward.1
= control target key start
LH: loop header
LB: loop body
LE: loop exit
PB: predicated region body
PF: predicated region fallthrough
CT: control target
= control target key end

     0   :  { %7 = vsyncpa [#allocation3], 0  ;;  %s547_s12 = smov [#allocation2]   ;;  %s548_s14 = smov 256   ;;  %s728_s0 = inlined_call_operand.vmem [shape: s32[72,1], index: 0, kind: input, shape index: {}]   ;;  %s729_s1 = inlined_call_operand.hbm [shape: f32[328,256], index: 1, kind: input, shape index: {}]   ;;  %s730_s2 = inlined_call_operand.vmem [shape: f32[72,128], index: 2, kind: output, shape index: {}]  }
   0x1   :  { %s14_s11 = sshll.u32 %s729_s1, 4  ;;  %s16_s13 = sshll.u32 %s547_s12, 4  ;;  %s15_s11 = int_to_ptr.hbm [resolvable:$true] %s14_s11  ;;  %s17_s13 = int_to_ptr.vmem [resolvable:$true] %s16_s13 }
   0x2   :  { %s549_s15 = smov 16  }
   0x3   :  { %22 = dma.hbm_to_vmem [thread:$0]  %s15_s11, 10496, %s17_s13, [#allocation3], %s548_s14, %s548_s14, %s549_s15  }
   0x4   :  { %545 = dma.done.wait [#allocation3], 10496  }
   0x5   :  { %546 = vsyncadd [#allocation3], 4294956800  ;;  %v550_v0 = vmov 0   ;;  %v27_v1 = vld [vmem:[%s728_s0] sm:$0xff]  ;;  %v122_v3 = vld [vmem:[#allocation2 + $0xf0] sm:$0xff]  ;;  %v36_v40 = vlaneseq  ;;  %v551_v46 = vmov 1.0  }
   0x6   :  { %518 = vset.pattern.permute.xlu0 %v550_v0  ;;  %520 = vset.pattern.permute.xlu2 %v550_v0  ;;  %v35_v2 = vld [vmem:[%s728_s0 + $0x40] sm:$0xff]  ;;  %v123_v4 = vld [vmem:[#allocation2 + $0xf8] sm:$0xff]  ;;  %v121_v6 = vld [vmem:[#allocation2 + $0xe8] sm:$0xff] }
   0x7   :  { %519 = vset.pattern.permute.xlu1 %v550_v0  ;;  %39 = vperm.xlu0 %518, %v27_v1   ;;  %v120_v5 = vld [vmem:[#allocation2 + $0xe0] sm:$0xff]  ;;  %v118_v7 = vld [vmem:[#allocation2 + $0xd0] sm:$0xff]  ;;  %v119_v8 = vld [vmem:[#allocation2 + $0xd8] sm:$0xff]  ;;  %v605_v43 = vand.u32 127, %v36_v40 }
   0x8   :  { %63 = vperm.xlu2 %520, %v35_v2   ;;  %124 = vmatpush.msra.mxu0 %v122_v3  ;;  %v116_v9 = vld [vmem:[#allocation2 + $0xc0] sm:$0xff]  ;;  %v32_v10 = vld [vmem:[%s728_s0 + $0x28] sm:$0xff]  ;;  %v114_v13 = vld [vmem:[#allocation2 + $0xb0] sm:$0xff]  ;;  %v552_v2 = vmov 683565275  }
   0x9   :  { %160 = vmatpush.msra.mxu1 %v123_v4  ;;  %475 = vmatpush.msra.mxu3 %v122_v3  ;;  %v117_v11 = vld [vmem:[#allocation2 + $0xc8] sm:$0xff]  ;;  %v115_v14 = vld [vmem:[#allocation2 + $0xb8] sm:$0xff]  ;;  %v112_v15 = vld [vmem:[#allocation2 + $0xa0] sm:$0xff] }
   0xa   :  { %125 = vmatpush.msra.mxu0 %v120_v5  ;;  %491 = vmatpush.msra.mxu2 %v123_v4  ;;  %v28_v12 = vld [vmem:[%s728_s0 + $0x8] sm:$0xff]  ;;  %v110_v17 = vld [vmem:[#allocation2 + $0x90] sm:$0xff]  ;;  %v111_v18 = vld [vmem:[#allocation2 + $0x98] sm:$0xff]  ;;  %v553_v4 = vmov 2475754826  }
   0xb   :  { %161 = vmatpush.msra.mxu1 %v121_v6  ;;  %476 = vmatpush.msra.mxu3 %v120_v5  ;;  %v113_v16 = vld [vmem:[#allocation2 + $0xa8] sm:$0xff]  ;;  %v108_v19 = vld [vmem:[#allocation2 + $0x80] sm:$0xff]  ;;  %v29_v20 = vld [vmem:[%s728_s0 + $0x10] sm:$0xff] }
   0xc   :  { %126 = vmatpush.msra.mxu0 %v118_v7  ;;  %492 = vmatpush.msra.mxu2 %v121_v6  ;;  %v109_v21 = vld [vmem:[#allocation2 + $0x88] sm:$0xff]  ;;  %v106_v22 = vld [vmem:[#allocation2 + $0x70] sm:$0xff]  ;;  %v107_v23 = vld [vmem:[#allocation2 + $0x78] sm:$0xff] }
   0xd   :  { %162 = vmatpush.msra.mxu1 %v119_v8  ;;  %477 = vmatpush.msra.mxu3 %v118_v7  ;;  %v104_v24 = vld [vmem:[#allocation2 + $0x60] sm:$0xff]  ;;  %v105_v25 = vld [vmem:[#allocation2 + $0x68] sm:$0xff]  ;;  %v102_v26 = vld [vmem:[#allocation2 + $0x50] sm:$0xff] }
   0xe   :  { %127 = vmatpush.msra.mxu0 %v116_v9  ;;  %493 = vmatpush.msra.mxu2 %v119_v8  ;;  %v103_v27 = vld [vmem:[#allocation2 + $0x58] sm:$0xff]  ;;  %v100_v28 = vld [vmem:[#allocation2 + $0x40] sm:$0xff]  ;;  %v101_v29 = vld [vmem:[#allocation2 + $0x48] sm:$0xff]  ;;  %v554_v8 = vmov 2131351028  }
   0xf   :  { %54 = vperm.xlu0 %518, %v32_v10   ;;  %163 = vmatpush.msra.mxu1 %v117_v11  ;;  %v98_v30 = vld [vmem:[#allocation2 + $0x30] sm:$0xff]  ;;  %v99_v31 = vld [vmem:[#allocation2 + $0x38] sm:$0xff]  ;;  %v96_v32 = vld [vmem:[#allocation2 + $0x20] sm:$0xff] }
  0x10   :  { %42 = vperm.xlu2 %520, %v28_v12   ;;  %128 = vmatpush.msra.mxu0 %v114_v13  ;;  %v97_v33 = vld [vmem:[#allocation2 + $0x28] sm:$0xff]  ;;  %v94_v34 = vld [vmem:[#allocation2 + $0x10] sm:$0xff]  ;;  %v95_v35 = vld [vmem:[#allocation2 + $0x18] sm:$0xff] }
  0x11   :  { %164 = vmatpush.msra.mxu1 %v115_v14  ;;  %478 = vmatpush.msra.mxu3 %v116_v9  ;;  %v92_v36 = vld [vmem:[#allocation2] sm:$0xff]  ;;  %v93_v37 = vld [vmem:[#allocation2 + $0x8] sm:$0xff]  ;;  %v33_v38 = vld [vmem:[%s728_s0 + $0x30] sm:$0xff] }
  0x12   :  { %129 = vmatpush.msra.mxu0 %v112_v15  ;;  %494 = vmatpush.msra.mxu2 %v117_v11  ;;  %v31_v39 = vld [vmem:[%s728_s0 + $0x20] sm:$0xff]  ;;  %v34_v41 = vld [vmem:[%s728_s0 + $0x38] sm:$0xff]  ;;  %v555_v11 = vmov 2102212464  }
  0x13   :  { %165 = vmatpush.msra.mxu1 %v113_v16  ;;  %479 = vmatpush.msra.mxu3 %v114_v13  ;;  %v30_v45 = vld [vmem:[%s728_s0 + $0x18] sm:$0xff] }
  0x14   :  { %130 = vmatpush.msra.mxu0 %v110_v17  ;;  %495 = vmatpush.msra.mxu2 %v115_v14 }
  0x15   :  { %166 = vmatpush.msra.mxu1 %v111_v18  ;;  %480 = vmatpush.msra.mxu3 %v112_v15  ;;  %v556_v15 = vmov 920167782  }
  0x16   :  { %131 = vmatpush.msra.mxu0 %v108_v19  ;;  %496 = vmatpush.msra.mxu2 %v113_v16 }
  0x17   :  { %45 = vperm.xlu0 %518, %v29_v20   ;;  %167 = vmatpush.msra.mxu1 %v109_v21 }
  0x18   :  { %132 = vmatpush.msra.mxu0 %v106_v22  ;;  %481 = vmatpush.msra.mxu3 %v110_v17 }
  0x19   :  { %168 = vmatpush.msra.mxu1 %v107_v23  ;;  %497 = vmatpush.msra.mxu2 %v111_v18  ;;  %v557_v18 = vmov 1326507024  }
  0x1a   :  { %133 = vmatpush.msra.mxu0 %v104_v24  ;;  %482 = vmatpush.msra.mxu3 %v108_v19 }
  0x1b   :  { %169 = vmatpush.msra.mxu1 %v105_v25  ;;  %498 = vmatpush.msra.mxu2 %v109_v21 }
  0x1c   :  { %134 = vmatpush.msra.mxu0 %v102_v26  ;;  %483 = vmatpush.msra.mxu3 %v106_v22 }
  0x1d   :  { %170 = vmatpush.msra.mxu1 %v103_v27  ;;  %499 = vmatpush.msra.mxu2 %v107_v23 }
  0x1e   :  { %135 = vmatpush.msra.mxu0 %v100_v28  ;;  %484 = vmatpush.msra.mxu3 %v104_v24 }
  0x1f   :  { %171 = vmatpush.msra.mxu1 %v101_v29  ;;  %500 = vmatpush.msra.mxu2 %v105_v25 }
  0x20   :  { %136 = vmatpush.msra.mxu0 %v98_v30  ;;  %485 = vmatpush.msra.mxu3 %v102_v26 }
  0x21   :  { %172 = vmatpush.msra.mxu1 %v99_v31  ;;  %501 = vmatpush.msra.mxu2 %v103_v27 }
  0x22   :  { %137 = vmatpush.msra.mxu0 %v96_v32  ;;  %486 = vmatpush.msra.mxu3 %v100_v28 }
  0x23   :  { %173 = vmatpush.msra.mxu1 %v97_v33  ;;  %502 = vmatpush.msra.mxu2 %v101_v29 }
  0x24   :  { %138 = vmatpush.msra.mxu0 %v94_v34  ;;  %487 = vmatpush.msra.mxu3 %v98_v30 }
  0x25   :  { %174 = vmatpush.msra.mxu1 %v95_v35  ;;  %503 = vmatpush.msra.mxu2 %v99_v31 }
  0x26   :  { %488 = vmatpush.msra.mxu3 %v96_v32  ;;  %139 = vmatpush.msra.mxu0 %v92_v36 }
  0x27   :  { %504 = vmatpush.msra.mxu2 %v97_v33  ;;  %175 = vmatpush.msra.mxu1 %v93_v37 }
  0x28   :  { %489 = vmatpush.msra.mxu3 %v94_v34  ;;  %57 = vperm.xlu1 %519, %v33_v38  }
  0x29   :  { %505 = vmatpush.msra.mxu2 %v95_v35  ;;  %51 = vperm.xlu2 %520, %v31_v39  }
  0x2a   :  { %490 = vmatpush.msra.mxu3 %v92_v36 }
  0x2b   :  { %506 = vmatpush.msra.mxu2 %v93_v37 }
  0x30   :  { %60 = vperm.xlu1 %519, %v34_v41  }
  0x38   :  { %48 = vperm.xlu1 %519, %v30_v45  }
  0x62   :  { %v603_v42 = vpop.permute.xlu2 %63 }
  0x6a   :  { %v43_v47 = vpop.permute.xlu2 %42 }
  0x6b   :  { %vm66_vm1 = vcmp.eq.s32.totalorder %v43_v47, %v605_v43 }
  0x79   :  { %v40_v44 = vpop.permute.xlu0 %39 }
  0x7a   :  { %vm65_vm0 = vcmp.eq.s32.totalorder %v40_v44, %v605_v43 }
  0x7b   :  { %453 = vmatmul.msk.f32.vlgmr.msra.gmra.mxu0 %vm65_vm0, %v551_v46  ;;  %462 = vmatmul.msk.f32.vlgmr.msra.gmra.mxu1 %vm65_vm0, %v551_v46 }
  0x81   :  { %v55_v48 = vpop.permute.xlu0 %54 }
  0x82   :  { %vm70_vm2 = vcmp.eq.s32.totalorder %v55_v48, %v605_v43 }
  0x83   :  { %454 = vmatmul.msk.f32.gmra.mxu0 %vm66_vm1, %v551_v46  ;;  %458 = vmatmul.msk.f32.vlgmr.msra.gmra.mxu3 %vm70_vm2, %v551_v46 }
  0x84   :  { %463 = vmatmul.msk.f32.gmra.mxu1 %vm66_vm1, %v551_v46  ;;  %467 = vmatmul.msk.f32.vlgmr.msra.gmra.mxu2 %vm70_vm2, %v551_v46  ;;  %vm73_vm2 = vcmp.eq.s32.totalorder %v603_v42, %v605_v43  ;;  %v363_v42 = vld [vmem:[#allocation2 + $0x140] sm:$0xff] }
  0x89   :  { %v46_v49 = vpop.permute.xlu0 %45 }
  0x8a   :  { %vm67_vm3 = vcmp.eq.s32.totalorder %v46_v49, %v605_v43 }
  0x8b   :  { %455 = vmatmul.msk.f32.gmra.mxu0 %vm67_vm3, %v551_v46 }
  0x8c   :  { %464 = vmatmul.msk.f32.gmra.mxu1 %vm67_vm3, %v551_v46 }
  0x9a   :  { %v58_v49 = vpop.permute.xlu1 %57 }
  0x9b   :  { %vm71_vm13 = vcmp.eq.s32.totalorder %v58_v49, %v605_v43  ;;  %v362_v49 = vld [vmem:[#allocation2 + $0x130] sm:$0xff] }
  0x9c   :  { %459 = vmatmul.msk.f32.gmra.mxu3 %vm71_vm13, %v551_v46  ;;  %468 = vmatmul.msk.f32.gmra.mxu2 %vm71_vm13, %v551_v46 }
  0xf8   :  { %v622_v50 = vpop.f32.mrf.mxu0  ;;  %v624_v51 = vpop.f32.mrf.mxu1 }
  0xf9   :  { %v207_v52 = vand.u32 2139095040, %v622_v50  ;;  %v204_v55 = vand.u32 2147483647, %v622_v50 }
  0xfb   :  { %v208_v53 = vshrl.u32 %v207_v52, 23  ;;  %v211_v59 = vand.u32 8388607, %v204_v55 }
  0xfd   :  { %v471_v54 = vadd.s32 4294967169, %v208_v53  ;;  %v212_v63 = vor.u32 8388608, %v211_v59 }
  0xff   :  { %v214_v56 = vadd.s32 1, %v471_v54  ;;  %v647_v27 = vshll.u32 %v212_v63, 8 }
 0x100   :  { %v144_v57 = vpop.f32.mrf.mxu0 }
 0x101   :  { %vm215_vm4 = vcmp.gt.s32.totalorder %v214_v56, 0  ;;  %v180_v58 = vpop.f32.mrf.mxu1  ;;  %v253_v36 = vand.u32 65535, %v647_v27  ;;  %v254_v37 = vshrl.u32 %v647_v27, 16 }
 0x102   :  { %v216_v60 = vsel %vm215_vm4, %v214_v56, 0  ;;  %431 = vst [vmem:[%s730_s2 + $0x8] sm:$0xff] %v180_v58 }
 0x103   :  { %v218_v61 = vand.u32 31, %v216_v60  ;;  %v635_v1 = vshrl.u32 %v216_v60, 5 }
 0x105   :  { %v633_v62 = vsub.s32 32, %v218_v61  ;;  %v221_v3 = vshll.u32 %v552_v2, %v218_v61  ;;  %v224_v5 = vshll.u32 %v553_v4, %v218_v61  ;;  %v227_v10 = vshll.u32 %v554_v8, %v218_v61 }
 0x106   :  { %v152_v6 = vpop.f32.mrf.mxu3  ;;  %v230_v14 = vshll.u32 %v555_v11, %v218_v61  ;;  %v233_v17 = vshll.u32 %v556_v15, %v218_v61  ;;  %vm236_vm5 = vcmp.lt.s32.totalorder %v635_v1, 1  ;;  %vm239_vm6 = vcmp.lt.s32.totalorder %v635_v1, 4 }
 0x107   :  { %v222_v7 = vshrl.u32 %v553_v4, %v633_v62  ;;  %v225_v9 = vshrl.u32 %v554_v8, %v633_v62  ;;  %v228_v12 = vshrl.u32 %v555_v11, %v633_v62  ;;  %v192_v13 = vpop.f32.mrf.mxu2  ;;  %v231_v16 = vshrl.u32 %v556_v15, %v633_v62 }
 0x108   :  { %v234_v19 = vshrl.u32 %v557_v18, %v633_v62  ;;  %435 = vst [vmem:[%s730_s2 + $0x28] sm:$0xff] %v192_v13  ;;  %v146_v20 = vpop.f32.mrf.mxu0  ;;  %vm238_vm7 = vcmp.lt.s32.totalorder %v635_v1, 3  ;;  %vm237_vm8 = vcmp.lt.s32.totalorder %v635_v1, 2  ;;  %v220_v4 = vshrl.u32 %v552_v2, %v633_v62  ;;  %v61_v2 = vpop.permute.xlu1 %60  ;;  %v370_v1 = vld [vmem:[#allocation2 + $0x1b0] sm:$0xff] }
 0x109   :  { %v223_v21 = vor.u32 %v222_v7, %v221_v3  ;;  %v226_v22 = vor.u32 %v225_v9, %v224_v5  ;;  %v229_v23 = vor.u32 %v228_v12, %v227_v10  ;;  %v183_v24 = vpop.f32.mrf.mxu1  ;;  %v232_v25 = vor.u32 %v231_v16, %v230_v14 }
 0x10a   :  { %v235_v26 = vor.u32 %v234_v19, %v233_v17  ;;  %432 = vst [vmem:[%s730_s2 + $0x10] sm:$0xff] %v183_v24  ;;  %vm72_vm15 = vcmp.eq.s32.totalorder %v61_v2, %v605_v43 }
 0x10b   :  { %v244_v28 = vsel %vm236_vm5, %v223_v21, %v226_v22  ;;  %v248_v29 = vsel %vm236_vm5, %v226_v22, %v229_v23  ;;  %v245_v30 = vsel %vm239_vm6, %v232_v25, 920167782  ;;  %v241_v7 = vsel %vm239_vm6, %v229_v23, 2102212464  ;;  %460 = vmatmul.msk.f32.gmra.mxu3 %vm72_vm15, %v551_v46  ;;  %469 = vmatmul.msk.f32.gmra.mxu2 %vm72_vm15, %v551_v46 }
 0x10c   :  { %v249_v31 = vsel %vm239_vm6, %v235_v26, 1326507024  ;;  %v246_v32 = vsel %vm238_vm7, %v229_v23, %v245_v30  ;;  %v240_v13 = vsel %vm236_vm5, %v220_v4, %v223_v21  ;;  %v242_v15 = vsel %vm238_vm7, %v226_v22, %v241_v7  ;;  %v372_v26 = vld [vmem:[#allocation2 + $0x1d0] sm:$0xff]  ;;  %v371_v30 = vld [vmem:[#allocation2 + $0x1c0] sm:$0xff] }
 0x10d   :  { %v250_v33 = vsel %vm238_vm7, %v232_v25, %v249_v31  ;;  %v247_v34 = vsel %vm237_vm8, %v244_v28, %v246_v32  ;;  %v243_v21 = vsel %vm237_vm8, %v240_v13, %v242_v15  ;;  %v373_v25 = vld [vmem:[#allocation2 + $0x1e0] sm:$0xff]  ;;  %vm206_vm5 = vcmp.lt.s32.totalorder %v622_v50, 0 }
 0x10e   :  { %v251_v35 = vsel %vm237_vm8, %v248_v29, %v250_v33  ;;  %v277_v40 = vand.u32 65535, %v247_v34  ;;  %v278_v41 = vshrl.u32 %v247_v34, 16  ;;  %v297_v28 = vmul.u32 %v647_v27, %v243_v21  ;;  %v369_v27 = vld [vmem:[#allocation2 + $0x1a0] sm:$0xff]  ;;  %v52_v34 = vpop.permute.xlu2 %51 }
 0x10f   :  { %v255_v38 = vand.u32 65535, %v251_v35  ;;  %v256_v39 = vshrl.u32 %v251_v35, 16  ;;  %vm69_vm1 = vcmp.eq.s32.totalorder %v52_v34, %v605_v43  ;;  %vm205_vm6 = vcmp.le.f32.partialorder %v204_v55, 0.7853982  ;;  %v401_v34 = vld [vmem:[#allocation2 + $0x240] sm:$0xff] }
 0x110   :  { %v280_v47 = vmul.u32 %v278_v41, %v253_v36  ;;  %v281_v48 = vmul.u32 %v277_v40, %v254_v37  ;;  %v279_v56 = vmul.u32 %v277_v40, %v253_v36  ;;  %v282_v60 = vmul.u32 %v278_v41, %v254_v37  ;;  %v49_v31 = vpop.permute.xlu1 %48  ;;  %v366_v40 = vld [vmem:[#allocation2 + $0x170] sm:$0xff] }
 0x111   :  { %v258_v44 = vmul.u32 %v256_v39, %v253_v36  ;;  %v259_v45 = vmul.u32 %v255_v38, %v254_v37  ;;  %v257_v52 = vmul.u32 %v255_v38, %v253_v36  ;;  %v260_v54 = vmul.u32 %v256_v39, %v254_v37  ;;  %v368_v36 = vld [vmem:[#allocation2 + $0x190] sm:$0xff]  ;;  %v367_v38 = vld [vmem:[#allocation2 + $0x180] sm:$0xff] }
 0x112   :  { %v283_v57 = vshll.u32 %v280_v47, 16  ;;  %v285_v63 = vshll.u32 %v281_v48, 16  ;;  %v284_v14 = vshrl.u32 %v280_v47, 16  ;;  %v286_v18 = vshrl.u32 %v281_v48, 16  ;;  %v364_v47 = vld [vmem:[#allocation2 + $0x150] sm:$0xff] }
 0x113   :  { %v261_v53 = vshll.u32 %v258_v44, 16  ;;  %v263_v58 = vshll.u32 %v259_v45, 16  ;;  %v262_v10 = vshrl.u32 %v258_v44, 16  ;;  %v264_v16 = vshrl.u32 %v259_v45, 16  ;;  %v365_v44 = vld [vmem:[#allocation2 + $0x160] sm:$0xff]  ;;  %461 = vmatmul.msk.f32.gmra.mxu3 %vm73_vm2, %v551_v46  ;;  %470 = vmatmul.msk.f32.gmra.mxu2 %vm73_vm2, %v551_v46 }
 0x114   :  { %vm287_vm10 = vc.u32 %v279_v56, %v283_v57  ;;  %v289_v3 = vadd.s32 %v283_v57, %v279_v56  ;;  %vm68_vm0 = vcmp.eq.s32.totalorder %v49_v31, %v605_v43 }
 0x115   :  { %vm265_vm9 = vc.u32 %v257_v52, %v261_v53  ;;  %v267_v59 = vadd.s32 %v261_v53, %v257_v52  ;;  %v288_v6 = vsel %vm287_vm10, 1, %v550_v0  ;;  %456 = vmatmul.msk.f32.gmra.mxu0 %vm68_vm0, %v551_v46  ;;  %465 = vmatmul.msk.f32.gmra.mxu1 %vm68_vm0, %v551_v46  ;;  %v361_v53 = vld [vmem:[#allocation2 + $0x120] sm:$0xff]  ;;  %vm347_vm10 = vweird.f32 %v622_v50 }
 0x116   :  { %v266_v61 = vsel %vm265_vm9, 1, %v550_v0  ;;  %v290_v9 = vadd.s32 %v288_v6, %v282_v60  ;;  %vm291_vm12 = vc.u32 %v289_v3, %v285_v63  ;;  %v293_v23 = vadd.s32 %v289_v3, %v285_v63 }
 0x117   :  { %v268_v5 = vadd.s32 %v266_v61, %v260_v54  ;;  %vm269_vm11 = vc.u32 %v267_v59, %v263_v58  ;;  %v292_v12 = vsel %vm291_vm12, 1, %v550_v0  ;;  %v360_v58 = vld [vmem:[#allocation2 + $0x110] sm:$0xff] }
 0x118   :  { %v270_v8 = vsel %vm269_vm11, 1, %v550_v0  ;;  %v294_v62 = vadd.s32 %v292_v12, %v290_v9  ;;  %v374_v0 = vld [vmem:[#allocation2 + $0x1f0] sm:$0xff]  ;;  %vm405_vm11 = vcmask 523264  }
 0x119   :  { %v272_v11 = vadd.s32 %v270_v8, %v268_v5  ;;  %376 = vmatpush.msrb.mxu2 %v374_v0 }
 0x11a   :  { %v295_v19 = vadd.s32 %v294_v62, %v284_v14 }
 0x11b   :  { %v273_v17 = vadd.s32 %v272_v11, %v262_v10  ;;  %377 = vmatpush.msrb.mxu2 %v373_v25 }
 0x11c   :  { %v296_v24 = vadd.s32 %v295_v19, %v286_v18 }
 0x11d   :  { %v274_v20 = vadd.s32 %v273_v17, %v264_v16  ;;  %378 = vmatpush.msrb.mxu2 %v372_v26  ;;  %457 = vmatmul.msk.f32.gmra.mxu0 %vm69_vm1, %v551_v46 }
 0x11e   :  { %v300_v22 = vadd.s32 1, %v296_v24  ;;  %466 = vmatmul.msk.f32.gmra.mxu1 %vm69_vm1, %v551_v46  ;;  %v359_v46 = vld [vmem:[#allocation2 + $0x100] sm:$0xff] }
 0x11f   :  { %vm299_vm14 = vc.u32 %v274_v20, %v293_v23  ;;  %379 = vmatpush.msrb.mxu2 %v371_v30  ;;  %v298_v54 = vadd.s32 %v293_v23, %v274_v20 }
 0x120   :  { %v301_v29 = vsel %vm299_vm14, %v300_v22, %v296_v24 }
 0x121   :  { %v302_v32 = vadd.s32 %v301_v29, %v297_v28  ;;  %380 = vmatpush.msrb.mxu2 %v370_v1  ;;  %v404_v1 = vld [vmem:[#allocation2 + $0x270] sm:$0xff] }
 0x122   :  { %417 = vmatpush.msrb.mxu3 %v404_v1 }
 0x123   :  { %v303_v33 = vadd.s32 536870912, %v302_v32  ;;  %381 = vmatpush.msrb.mxu2 %v369_v27  ;;  %v402_v27 = vld [vmem:[#allocation2 + $0x250] sm:$0xff] }
 0x125   :  { %v304_v35 = vshrl.u32 %v303_v33, 30  ;;  %382 = vmatpush.msrb.mxu2 %v368_v36  ;;  %v403_v33 = vld [vmem:[#allocation2 + $0x260] sm:$0xff] }
 0x126   :  { %418 = vmatpush.msrb.mxu3 %v403_v33  ;;  %v399_v36 = vld [vmem:[#allocation2 + $0x220] sm:$0xff] }
 0x127   :  { %v305_v37 = vshll.u32 %v304_v35, 30  ;;  %383 = vmatpush.msrb.mxu2 %v367_v38  ;;  %v328_v10 = vsub.s32 4, %v304_v35  ;;  %v154_v38 = vpop.f32.mrf.mxu3 }
 0x128   :  { %419 = vmatpush.msrb.mxu3 %v402_v27 }
 0x129   :  { %v306_v39 = vsub.s32 %v302_v32, %v305_v37  ;;  %384 = vmatpush.msrb.mxu2 %v366_v40  ;;  %v329_v62 = vsel %vm206_vm5, %v328_v10, %v304_v35  ;;  %v400_v35 = vld [vmem:[#allocation2 + $0x230] sm:$0xff] }
 0x12a   :  { %v331_v16 = vsel %vm205_vm6, 0, %v329_v62  ;;  %420 = vmatpush.msrb.mxu3 %v401_v34  ;;  %v398_v37 = vld [vmem:[#allocation2 + $0x210] sm:$0xff] }
 0x12b   :  { %vm307_vm3 = vcmp.lt.s32.totalorder %v306_v39, 0  ;;  %v308_v41 = vsub.s32 0, %v306_v39  ;;  %385 = vmatpush.msrb.mxu2 %v365_v44  ;;  %v348_v20 = vadd.s32 3, %v331_v16 }
 0x12c   :  { %421 = vmatpush.msrb.mxu3 %v400_v35 }
 0x12d   :  { %v309_v45 = vsel %vm307_vm3, %v308_v41, %v306_v39  ;;  %386 = vmatpush.msrb.mxu2 %v364_v47  ;;  %v349_v25 = vand.u32 3, %v348_v20 }
 0x12e   :  { %v310_v48 = vclz %v309_v45  ;;  %422 = vmatpush.msrb.mxu3 %v399_v36 }
 0x12f   :  { %387 = vmatpush.msrb.mxu2 %v363_v42  ;;  %vm351_vm7 = vcmp.eq.s32.totalorder %v349_v25, 0  ;;  %vm354_vm8 = vcmp.eq.s32.totalorder %v349_v25, 2  ;;  %vm350_vm9 = vcmp.lt.s32.totalorder %v349_v25, 2 }
 0x130   :  { %v472_v43 = vadd.s32 4294967294, %v310_v48  ;;  %423 = vmatpush.msrb.mxu3 %v398_v37 }
 0x131   :  { %388 = vmatpush.msrb.mxu2 %v362_v49  ;;  %v375_v49 = vld [vmem:[#allocation2 + $0x280] ss:$0 sm:$0xff] }
 0x132   :  { %vm473_vm4 = vcmp.lt.s32.totalorder %v472_v43, 0 }
 0x133   :  { %v313_v52 = vsel %vm473_vm4, 0, %v472_v43  ;;  %389 = vmatpush.msrb.mxu2 %v361_v53  ;;  %v397_v43 = vld [vmem:[#allocation2 + $0x200] sm:$0xff] }
 0x134   :  { %v314_v56 = vsub.s32 32, %v313_v52  ;;  %v318_v57 = vsub.s32 4294967266, %v313_v52  ;;  %v315_v59 = vshll.u32 %v306_v39, %v313_v52  ;;  %v195_v39 = vpop.f32.mrf.mxu2  ;;  %424 = vmatpush.msrb.mxu3 %v397_v43 }
 0x135   :  { %390 = vmatpush.msrb.mxu2 %v360_v58  ;;  %436 = vst [vmem:[%s730_s2 + $0x30] sm:$0xff] %v195_v39 }
 0x136   :  { %v316_v60 = vshrl.u32 %v298_v54, %v314_v56  ;;  %v319_v61 = vadd.s32 127, %v318_v57 }
 0x137   :  { %391 = vmatpush.msrb.mxu2 %v359_v46 }
 0x138   :  { %v317_v63 = vor.u32 %v316_v60, %v315_v59  ;;  %v320_v3 = vshll.u32 %v319_v61, 23 }
 0x13a   :  { %v321_v4 = vor.u32 4788187, %v320_v3  ;;  %v324_v6 = vcvt.s32.f32 %v317_v63 }
 0x13c   :  { %v322_v5 = vand.u32 2147483647, %v321_v4 }
 0x13e   :  { %v325_v7 = vmul.f32 %v324_v6, %v322_v5 }
 0x140   :  { %v326_v8 = vxor.u32 2147483648, %v325_v7 }
 0x142   :  { %v327_v9 = vsel %vm206_vm5, %v326_v8, %v325_v7 }
 0x143   :  { %v330_v11 = vsel %vm205_vm6, %v622_v50, %v327_v9 }
 0x144   :  { %v332_v12 = vmul.f32 %v330_v11, %v330_v11 }
 0x146   :  { %v333_v13 = vmul.f32 -0.001358992, %v332_v12  ;;  %v340_v14 = vmul.f32 -0.00019511016, %v332_v12 }
 0x148   :  { %v334_v2 = vadd.f32 0.041655596, %v333_v13  ;;  %v341_v15 = vadd.f32 0.008332121, %v340_v14 }
 0x14a   :  { %v335_v17 = vmul.f32 %v334_v2, %v332_v12  ;;  %v342_v18 = vmul.f32 %v341_v15, %v332_v12 }
 0x14c   :  { %v336_v19 = vadd.f32 -0.4999988, %v335_v17  ;;  %v343_v0 = vadd.f32 -0.16666654, %v342_v18 }
 0x14e   :  { %v337_v23 = vmul.f32 %v336_v19, %v332_v12  ;;  %v344_v21 = vmul.f32 %v343_v0, %v332_v12 }
 0x150   :  { %v338_v24 = vadd.f32 1.0, %v337_v23  ;;  %v345_v55 = vadd.f32 1.0, %v344_v21 }
 0x152   :  { %v346_v22 = vmul.f32 %v345_v55, %v330_v11  ;;  %v355_v26 = vxor.u32 2147483648, %v338_v24 }
 0x154   :  { %v352_v28 = vxor.u32 2147483648, %v346_v22  ;;  %v356_v30 = vsel %vm354_vm8, %v355_v26, %v346_v22 }
 0x156   :  { %v353_v29 = vsel %vm351_vm7, %v338_v24, %v352_v28 }
 0x157   :  { %v357_v31 = vsel %vm350_vm9, %v353_v29, %v356_v30 }
 0x158   :  { %v358_v32 = vsel %vm347_vm10, nan, %v357_v31 }
 0x159   :  { %392 = vmatmul.f32.vlgmr.msrb.gmra.mxu2 %v358_v32 }
 0x18e   :  { %v156_v41 = vpop.f32.mrf.mxu3  ;;  %v198_v44 = vpop.f32.mrf.mxu2 }
 0x18f   :  { %437 = vst [vmem:[%s730_s2 + $0x38] sm:$0xff] %v198_v44 }
 0x192   :  { %v148_v50 = vpop.f32.mrf.mxu0  ;;  %v186_v40 = vpop.f32.mrf.mxu1 }
 0x193   :  { %433 = vst [vmem:[%s730_s2 + $0x18] sm:$0xff] %v186_v40 }
 0x196   :  { %v158_v48 = vpop.f32.mrf.mxu3  ;;  %v201_v42 = vpop.f32.mrf.mxu2 }
 0x197   :  { %438 = vst [vmem:[%s730_s2 + $0x40] sm:$0xff] %v201_v42 }
 0x19a   :  { %v150_v45 = vpop.f32.mrf.mxu0 }
 0x19b   :  { %v189_v47 = vpop.f32.mrf.mxu1 }
 0x19c   :  { %434 = vst [vmem:[%s730_s2 + $0x20] sm:$0xff] %v189_v47 }
 0x1dc   :  { %v393_v52 = vpop.f32.mrf.mxu2 }
 0x1dd   :  { %v394_v53 = vadd.f32 %v393_v52, %v375_v49 }
 0x1df   :  { %v396_v54 = vmax.f32 %v394_v53, 0.0 }
 0x1e1   :  { %474 = vmatmul.msk.f32.vlgmr.msrb.gmra.mxu3 %vm405_vm11, %v396_v54 }
 0x264   :  { %v426_v56 = vpop.f32.mrf.mxu3 }
 0x265   :  { %v429_v57 = vadd.f32 %v426_v56, %v624_v51 }
 0x267   :  { %430 = vst [vmem:[%s730_s2] sm:$0xff] %v429_v57 }
 0x268   :  { %443 = vsyncpa [#allocation3], 1 }

</bundles_post_ra>
